<compile_context>
chip_gen: v7x
topology: tpu7x:2x2x1
jax: 0.10.0
libtpu: 0.0.40
codegen_flags: <defaults>
</compile_context>

<pallas_src>
import functools

import jax
import jax.numpy as jnp
from jax.experimental import pallas as pl
from jax.experimental.pallas import tpu as pltpu


def _gcn_kernel(a_ref, xw_ref, b_ref, o_ref, acc_ref):
    k = pl.program_id(1)

    @pl.when(k == 0)
    def _():
        acc_ref[...] = jnp.zeros_like(acc_ref)

    # Aggregation of already-projected features: acc += A_tile @ X'_tile
    acc_ref[...] += jnp.dot(
        a_ref[...], xw_ref[...], preferred_element_type=jnp.float32
    )

    @pl.when(k == pl.num_programs(1) - 1)
    def _():
        # Bias add only once, in the finalize branch; lane-dense store.
        o_ref[...] = (acc_ref[...] + b_ref[...]).astype(o_ref.dtype)


@functools.partial(jax.jit, static_argnames=("tm", "tk"))
def gcn_layer_pallas(adj, feature, weight, bias, *, tm=128, tk=128):
    """adj: [N, N] float (A[dst, src]), feature: [N, in], weight: [out, in],
    bias: [out].  Returns [N, out] = (A @ feature) @ weight.T + bias."""
    n, in_feats = feature.shape
    out_feats = weight.shape[0]

    # ---- Reassociate: X' = X @ W^T (tiny matmul, stays in the wrapper). ----
    xw = jnp.dot(feature, weight.T, preferred_element_type=jnp.float32)

    # ---- Lane-dense padding of the output/feature dim to a multiple of 128.
    f_pad = max(128, pl.cdiv(out_feats, 128) * 128)
    xw = jnp.pad(xw, ((0, 0), (0, f_pad - out_feats)))
    b_p = jnp.pad(bias.astype(jnp.float32), (0, f_pad - out_feats)).reshape(1, f_pad)

    # ---- Pad the node dimension so row / reduction tiles divide evenly. ----
    # (Extra A columns hit zero rows of X' -> no contribution; extra A rows
    #  only produce bias, and are sliced off below.)
    n_rows = pl.cdiv(n, tm) * tm
    n_cols = pl.cdiv(n, tk) * tk
    adj_p = jnp.pad(adj, ((0, n_rows - n), (0, n_cols - n))).astype(jnp.bfloat16)
    xw_p = jnp.pad(xw, ((0, n_cols - n), (0, 0))).astype(jnp.bfloat16)

    grid = (n_rows // tm, n_cols // tk)

    cost = pl.CostEstimate(
        flops=2 * n_rows * n_cols * f_pad,
        transcendentals=0,
        bytes_accessed=(
            adj_p.size * 2                    # bf16 adjacency stream
            + grid[0] * n_cols * f_pad * 2    # X' re-read per row tile (bf16)
            + n_rows * f_pad * 4              # f32 output
            + f_pad * 4                       # bias
        ),
    )

    out_p = pl.pallas_call(
        _gcn_kernel,
        out_shape=jax.ShapeDtypeStruct((n_rows, f_pad), feature.dtype),
        grid_spec=pltpu.PrefetchScalarGridSpec(
            num_scalar_prefetch=0,
            grid=grid,
            in_specs=[
                pl.BlockSpec((tm, tk), lambda i, k: (i, k)),     # A tile
                pl.BlockSpec((tk, f_pad), lambda i, k: (k, 0)),  # X' tile
                pl.BlockSpec((1, f_pad), lambda i, k: (0, 0)),   # bias (resident)
            ],
            out_specs=pl.BlockSpec((tm, f_pad), lambda i, k: (i, 0)),
            scratch_shapes=[pltpu.VMEM((tm, f_pad), jnp.float32)],
        ),
        compiler_params=pltpu.CompilerParams(
            dimension_semantics=("parallel", "arbitrary"),
            vmem_limit_bytes=32 * 1024 * 1024,
        ),
        cost_estimate=cost,
    )(adj_p, xw_p, b_p)

    return out_p[:n, :out_feats]


if __name__ == "__main__":
    # Small synthetic graph + deterministic parameters.
    N, IN_FEATS, OUT_FEATS = 256, 32, 16

    key = jax.random.PRNGKey(0)
    k_adj, k_x, k_w, k_b = jax.random.split(key, 4)

    # Dense adjacency (A[dst, src] = 1.0 for an edge), ~20% density.
    adj = (jax.random.uniform(k_adj, (N, N)) < 0.2).astype(jnp.float32)
    feature = jax.random.normal(k_x, (N, IN_FEATS), dtype=jnp.float32)

    # nn.Linear(in_feats, out_feats): weight [out, in], bias [out]
    bound = 1.0 / (IN_FEATS ** 0.5)
    weight = jax.random.uniform(k_w, (OUT_FEATS, IN_FEATS),
                                minval=-bound, maxval=bound,
                                dtype=jnp.float32)
    bias = jax.random.uniform(k_b, (OUT_FEATS,),
                              minval=-bound, maxval=bound,
                              dtype=jnp.float32)

    out = gcn_layer_pallas(adj, feature, weight, bias)
    out = jax.block_until_ready(out)

    # Pure-JAX f32 reference (bf16 operand cast -> slightly looser tolerance).
    ref = (adj @ feature) @ weight.T + bias
    assert out.shape == (N, OUT_FEATS)
    assert jnp.allclose(out, ref, atol=5e-2, rtol=5e-2), float(
        jnp.max(jnp.abs(out - ref)))

    print("KERNEL_OK")
</pallas_src>

<mosaic_0001>
module attributes {stable_mosaic.version = 11 : i64} {
  func.func @_gcn_kernel(%arg0: i32, %arg1: i32, %arg2: memref<128x128xbf16, #tpu.memory_space<vmem>>, %arg3: memref<128x128xbf16, #tpu.memory_space<vmem>>, %arg4: memref<1x128xf32, #tpu.memory_space<vmem>>, %arg5: memref<128x128xf32, #tpu.memory_space<vmem>>, %arg6: memref<128x128xf32, #tpu.memory_space<vmem>>) attributes {dimension_semantics = [#tpu.dimension_semantics<parallel>, #tpu.dimension_semantics<arbitrary>], iteration_bounds = array<i64: 2, 2>, scalar_prefetch = 0 : i64, scratch_operands = 1 : i64, tpu.core_type = #tpu.core_type<tc>, window_params = [{transform_indices = @transform_0, window_bounds = array<i64: 128, 128>}, {transform_indices = @transform_1, window_bounds = array<i64: 128, 128>}, {pipeline_mode = #tpu.pipeline_mode<synchronous>, transform_indices = @transform_2, window_bounds = array<i64: 1, 128>}, {transform_indices = @transform_3, window_bounds = array<i64: 128, 128>}]} {
    %c0_i32 = arith.constant 0 : i32
    %0 = arith.cmpi eq, %arg1, %c0_i32 : i32
    %1 = arith.extui %0 : i1 to i32
    %c0_i32_0 = arith.constant 0 : i32
    %2 = arith.cmpi ne, %1, %c0_i32_0 : i32
    scf.if %2 {
      %cst_9 = arith.constant 0.000000e+00 : f32
      %12 = vector.broadcast %cst_9 : f32 to vector<128x128xf32>
      %c0_10 = arith.constant 0 : index
      %c0_11 = arith.constant 0 : index
      %13 = vector.load %arg6[%c0_10, %c0_11] : memref<128x128xf32, #tpu.memory_space<vmem>>, vector<128x128xf32>
      tpu.vector_store %arg6[%c0_10, %c0_11], %12 {strides = array<i32>} : memref<128x128xf32, #tpu.memory_space<vmem>>, vector<128x128xf32>,
    } else {
    }
    %c0 = arith.constant 0 : index
    %c0_1 = arith.constant 0 : index
    %3 = vector.load %arg6[%c0, %c0_1] : memref<128x128xf32, #tpu.memory_space<vmem>>, vector<128x128xf32>
    %c0_2 = arith.constant 0 : index
    %c0_3 = arith.constant 0 : index
    %4 = vector.load %arg2[%c0_2, %c0_3] : memref<128x128xbf16, #tpu.memory_space<vmem>>, vector<128x128xbf16>
    %c0_4 = arith.constant 0 : index
    %c0_5 = arith.constant 0 : index
    %5 = vector.load %arg3[%c0_4, %c0_5] : memref<128x128xbf16, #tpu.memory_space<vmem>>, vector<128x128xbf16>
    %cst = arith.constant dense<0.000000e+00> : vector<128x128xf32>
    %6 = tpu.matmul %4, %5, %cst {dimension_numbers = #tpu.dot_dimension_numbers<[1], [0], [0], [1], [0, 0, 1, 1], [], []>} : vector<128x128xbf16>, vector<128x128xbf16>, vector<128x128xf32> -> vector<128x128xf32>
    %7 = arith.addf %3, %6 : vector<128x128xf32>
    %c0_6 = arith.constant 0 : index
    %c0_7 = arith.constant 0 : index
    %8 = vector.load %arg6[%c0_6, %c0_7] : memref<128x128xf32, #tpu.memory_space<vmem>>, vector<128x128xf32>
    tpu.vector_store %arg6[%c0_6, %c0_7], %7 {strides = array<i32>} : memref<128x128xf32, #tpu.memory_space<vmem>>, vector<128x128xf32>,
    %c1_i32 = arith.constant 1 : i32
    %9 = arith.cmpi eq, %arg1, %c1_i32 : i32
    %10 = arith.extui %9 : i1 to i32
    %c0_i32_8 = arith.constant 0 : i32
    %11 = arith.cmpi ne, %10, %c0_i32_8 : i32
    scf.if %11 {
      %c0_9 = arith.constant 0 : index
      %c0_10 = arith.constant 0 : index
      %12 = vector.load %arg6[%c0_9, %c0_10] : memref<128x128xf32, #tpu.memory_space<vmem>>, vector<128x128xf32>
      %c0_11 = arith.constant 0 : index
      %c0_12 = arith.constant 0 : index
      %13 = vector.load %arg4[%c0_11, %c0_12] : memref<1x128xf32, #tpu.memory_space<vmem>>, vector<1x128xf32>
      %14 = vector.broadcast %13 : vector<1x128xf32> to vector<128x128xf32>
      %15 = arith.addf %12, %14 : vector<128x128xf32>
      %c0_13 = arith.constant 0 : index
      %c0_14 = arith.constant 0 : index
      %16 = vector.load %arg5[%c0_13, %c0_14] : memref<128x128xf32, #tpu.memory_space<vmem>>, vector<128x128xf32>
      tpu.vector_store %arg5[%c0_13, %c0_14], %15 {strides = array<i32>} : memref<128x128xf32, #tpu.memory_space<vmem>>, vector<128x128xf32>,
    } else {
    }
    return
  }
  func.func @transform_0(%arg0: i32, %arg1: i32) -> (i32, i32) {
    %c0_i32 = arith.constant 0 : i32
    return %arg0, %arg1 : i32, i32
  }
  func.func @transform_1(%arg0: i32, %arg1: i32) -> (i32, i32) {
    %c0_i32 = arith.constant 0 : i32
    %c0_i32_0 = arith.constant 0 : i32
    return %arg1, %c0_i32 : i32, i32
  }
  func.func @transform_2(%arg0: i32, %arg1: i32) -> (i32, i32) {
    %c0_i32 = arith.constant 0 : i32
    %c0_i32_0 = arith.constant 0 : i32
    %c0_i32_1 = arith.constant 0 : i32
    return %c0_i32, %c0_i32_0 : i32, i32
  }
  func.func @transform_3(%arg0: i32, %arg1: i32) -> (i32, i32) {
    %c0_i32 = arith.constant 0 : i32
    %c0_i32_0 = arith.constant 0 : i32
    return %arg0, %c0_i32 : i32, i32
  }
}

</mosaic_0001>

<bundles_post_ra>
// kernel: gcn_layer_pallas.1
= control target key start
LH: loop header
LB: loop body
LE: loop exit
PB: predicated region body
PF: predicated region fallthrough
CT: control target
= control target key end

     0   :  { %s1004_s12 = smov 0   ;;  %s1006_s13 = smov 0   ;;  %s1157_s0 = inlined_call_operand.vmem [shape: bf16[256,256], index: 0, kind: input, shape index: {}]   ;;  %s1158_s1 = inlined_call_operand.vmem [shape: bf16[256,128], index: 1, kind: input, shape index: {}]   ;;  %s1159_s2 = inlined_call_operand.vmem [shape: f32[1,128], index: 2, kind: input, shape index: {}]   ;;  %s1160_s3 = inlined_call_operand.vmem [shape: f32[256,128], index: 3, kind: output, shape index: {}]  }
   0x1   :  { %s1008_s14 = smov 0   ;;  %s1010_s15 = smov 0  }
   0x2   :  { %s1012_s16 = smov 0   ;;  %s1014_s17 = smov 0  }
   0x3   :  { %s1016_s18 = smov 0  }
   0x4 LB: > { %s22_s19 = sadd.s32 1, %s973_s16  ;;  %s25_s20 = sadd.s32 1, %s977_s17  ;;  %s981_s18 = sphi %s1016_s18, %s13_s18   ;;  %s977_s17 = sphi %s1014_s17, %s1166_s17   ;;  %s973_s16 = sphi %s1012_s16, %s1165_s16   ;;  %s969_s15 = sphi %s1010_s15, %s1164_s15   ;;  %s965_s14 = sphi %s1008_s14, %s1163_s14   ;;  %s961_s13 = sphi %s1006_s13, %s1162_s13   ;;  %s957_s12 = sphi %s1004_s12, %s1161_s12  }
   0x5   : > { %p23_p0 = scmp.ge.s32.totalorder %s22_s19, 2  ;;  %p41_p1 = scmp.ne.s32.totalorder %s961_s13, %s957_s12 }
   0x6   : > { %p42_p2 = scmp.eq.s32.totalorder %s981_s18, 0  ;;  %s34_s24 = sadd.s32 1, %s961_s13 }
   0x7   : > { %s1168_s19 = smov (%p23_p0, %s22_s19), 0  ;;  %s1170_s20 = smov (!%p23_p0, %s25_s20), %s977_s17 }
   0x8   : > { %p43_p3 = por %p42_p2, %p41_p1  ;;  %p27_p4 = scmp.ge.s32.totalorder %s1170_s20, 2 }
   0x9   : > { %s30_s21 = ssub.s32 %s973_s16, %s1168_s19  ;;  %p757_p6 = scmp.ge.s32.totalorder %s981_s18, 4 }
   0xa   : > { %s1172_s20 = smov (%p27_p4, %s1170_s20), 0 }
   0xb   : > { %s29_s22 = ssub.s32 %s977_s17, %s1172_s20  ;;  %143 = sbr.rel (%p757_p6) target bundleno = 34 (0x22), region = 20 }
   0xc   : > { %s31_s23 = sor.u32 %s30_s21, %s29_s22 }
   0xd   : > { %p32_p5 = scmp.eq.s32.totalorder %s31_s23, 0 }
   0xf   : > { %s1055_s25 = scalar_select %p32_p5, %s961_s13, %s34_s24  }
  0x12   : > { %146 = sbr.rel (!%p43_p3) target bundleno = 34 (0x22), region = 24  ;;  %s148_s26 = sand.u32 (%p43_p3), 1, %s961_s13  }
  0x13   : > { %s789_s27 = sshll.u32 (%p43_p3), %s977_s17, 5  ;;  %s758_s28 = sshll.u32 (%p43_p3), %s148_s26, 6 }
  0x14   : > { %s153_s29 = sadd.s32 (%p43_p3), %s973_s16, %s789_s27  ;;  %s150_s7 = scalar_lea.vmem (%p43_p3), [#allocation3], %s758_s28 }
  0x15   : > { %s761_s30 = sshll.u32 (%p43_p3), %s153_s29, 2 }
  0x16   : > { %s1064_s6 = scalar_lea.vmem (%p43_p3), %s1157_s0, %s761_s30 }
  0x17   : > { %v171_v0 = vld [vmem:[%s1064_s6] sm:$0xf] (%p43_p3)  ;;  %v173_v1 = vld [vmem:[%s1064_s6 + $0x8] sm:$0xf] (%p43_p3)  ;;  %v175_v2 = vld [vmem:[%s1064_s6 + $0x10] sm:$0xf] (%p43_p3) }
  0x18   : > { %172 = vst [vmem:[%s150_s7] sm:$0xf] (%p43_p3), %v171_v0  ;;  %174 = vst [vmem:[%s150_s7 + $0x4] sm:$0xf] (%p43_p3), %v173_v1  ;;  %v177_v3 = vld [vmem:[%s1064_s6 + $0x18] sm:$0xf] (%p43_p3) }
  0x19   : > { %176 = vst [vmem:[%s150_s7 + $0x8] sm:$0xf] %v175_v2  ;;  %v179_v4 = vld [vmem:[%s1064_s6 + $0x20] sm:$0xf]  ;;  %v181_v5 = vld [vmem:[%s1064_s6 + $0x28] sm:$0xf] }
  0x1a   : > { %178 = vst [vmem:[%s150_s7 + $0xc] sm:$0xf] %v177_v3  ;;  %180 = vst [vmem:[%s150_s7 + $0x10] sm:$0xf] %v179_v4  ;;  %v183_v6 = vld [vmem:[%s1064_s6 + $0x30] sm:$0xf] }
  0x1b   : > { %182 = vst [vmem:[%s150_s7 + $0x14] sm:$0xf] %v181_v5  ;;  %v185_v7 = vld [vmem:[%s1064_s6 + $0x38] sm:$0xf]  ;;  %v187_v8 = vld [vmem:[%s1064_s6 + $0x40] sm:$0xf] }
  0x1c   : > { %184 = vst [vmem:[%s150_s7 + $0x18] sm:$0xf] %v183_v6  ;;  %186 = vst [vmem:[%s150_s7 + $0x1c] sm:$0xf] %v185_v7  ;;  %v189_v9 = vld [vmem:[%s1064_s6 + $0x48] sm:$0xf] }
  0x1d   : > { %188 = vst [vmem:[%s150_s7 + $0x20] sm:$0xf] %v187_v8  ;;  %v191_v10 = vld [vmem:[%s1064_s6 + $0x50] sm:$0xf]  ;;  %v193_v11 = vld [vmem:[%s1064_s6 + $0x58] sm:$0xf] }
  0x1e   : > { %190 = vst [vmem:[%s150_s7 + $0x24] sm:$0xf] %v189_v9  ;;  %192 = vst [vmem:[%s150_s7 + $0x28] sm:$0xf] %v191_v10  ;;  %v195_v12 = vld [vmem:[%s1064_s6 + $0x60] sm:$0xf] }
  0x1f   : > { %194 = vst [vmem:[%s150_s7 + $0x2c] sm:$0xf] %v193_v11  ;;  %v197_v13 = vld [vmem:[%s1064_s6 + $0x68] sm:$0xf]  ;;  %v199_v14 = vld [vmem:[%s1064_s6 + $0x70] sm:$0xf] }
  0x20   : > { %196 = vst [vmem:[%s150_s7 + $0x30] sm:$0xf] %v195_v12  ;;  %198 = vst [vmem:[%s150_s7 + $0x34] sm:$0xf] %v197_v13  ;;  %v201_v15 = vld [vmem:[%s1064_s6 + $0x78] sm:$0xf] }
  0x21   : > { %200 = vst [vmem:[%s150_s7 + $0x38] sm:$0xf] %v199_v14  ;;  %202 = vst [vmem:[%s150_s7 + $0x3c] sm:$0xf] %v201_v15 }
  0x22 PF: > { %p762_p7 = scmp.ge.s32.totalorder %s981_s18, 1  ;;  %p265_p8 = scmp.lt.s32.totalorder %s981_s18, 5 }
  0x24   : > { %p266_p9 = pnand %p762_p7, %p265_p8 }
  0x25   : > { %s272_s8 = sand.u32 (!%p266_p9), 1, %s957_s12   ;;  %s764_s9 = sshll.u32 (!%p266_p9), %s965_s14, 4 }
  0x26   : > { %269 = sbr.rel (%p266_p9) target bundleno = 325 (0x145), region = 69  ;;  %s763_s10 = sshll.u32 (!%p266_p9), %s272_s8, 6 }
  0x27   : > { %p302_p10 = scmp.lt.s32.totalorder (!%p266_p9), %s764_s9, 31  ;;  %s766_s11 = sshll.u32 (!%p266_p9), %s969_s15, 4 }
  0x28   : > { %p308_p11 = scmp.lt.s32.totalorder (!%p266_p9), %s766_s11, 31  ;;  %s1097_s12 = scalar_lea.vmem (!%p266_p9), [#allocation3], %s763_s10 }
  0x29   : > { %p768_p12 = scmp.ne.s32.totalorder (!%p266_p9), %s965_s14, 0 }
  0x2d   : > { %s1174_s9 = smov (!%p302_p10, %s764_s9), 31  ;;  %s1176_s11 = smov (!%p308_p11, %s766_s11), 31 }
  0x2e   : > { %s765_s21 = sshll.u32 %s1174_s9, 2  ;;  %s767_s26 = sshll.u32 %s1176_s11, 3  ;;  %v983_v16 = vmov (!%p768_p12), 0.0  }
  0x2f   : > { %s1090_s24 = scalar_lea.vmem %s1158_s1, %s765_s21  ;;  %s1095_s29 = scalar_lea.vmem %s1160_s3, %s767_s26  ;;  %318 = vst [vmem:[#allocation2] sm:$0xff] (!%p768_p12), %v983_v16  ;;  %319 = vst [vmem:[#allocation2 + $0x8] sm:$0xff] (!%p768_p12), %v983_v16 }
  0x30   : > { %317 = sbr.rel (%p768_p12) target bundleno = 55 (0x37), region = 77  ;;  %320 = vst [vmem:[#allocation2 + $0x10] sm:$0xff] (!%p768_p12), %v983_v16  ;;  %321 = vst [vmem:[#allocation2 + $0x18] sm:$0xff] (!%p768_p12), %v983_v16 }
  0x31   : > { %322 = vst [vmem:[#allocation2 + $0x20] sm:$0xff] (!%p768_p12), %v983_v16  ;;  %323 = vst [vmem:[#allocation2 + $0x28] sm:$0xff] (!%p768_p12), %v983_v16 }
  0x32   : > { %324 = vst [vmem:[#allocation2 + $0x30] sm:$0xff] (!%p768_p12), %v983_v16  ;;  %325 = vst [vmem:[#allocation2 + $0x38] sm:$0xff] (!%p768_p12), %v983_v16 }
  0x33   : > { %326 = vst [vmem:[#allocation2 + $0x40] sm:$0xff] (!%p768_p12), %v983_v16  ;;  %327 = vst [vmem:[#allocation2 + $0x48] sm:$0xff] (!%p768_p12), %v983_v16 }
  0x34   : > { %328 = vst [vmem:[#allocation2 + $0x50] sm:$0xff] (!%p768_p12), %v983_v16  ;;  %329 = vst [vmem:[#allocation2 + $0x58] sm:$0xff] (!%p768_p12), %v983_v16 }
  0x35   : > { %330 = vst [vmem:[#allocation2 + $0x60] sm:$0xff] (!%p768_p12), %v983_v16  ;;  %331 = vst [vmem:[#allocation2 + $0x68] sm:$0xff] (!%p768_p12), %v983_v16 }
  0x36   : > { %332 = vst [vmem:[#allocation2 + $0x70] sm:$0xff] (!%p768_p12), %v983_v16  ;;  %333 = vst [vmem:[#allocation2 + $0x78] sm:$0xff] (!%p768_p12), %v983_v16 }
  0x37 PF: > { %v911_v17 = vld [vmem:[%s1090_s24] sm:$0xff]   ;;  %v912_v18 = vld [vmem:[%s1090_s24 + $0x8] sm:$0xff]   ;;  %v913_v19 = vld [vmem:[%s1090_s24 + $0x10] sm:$0xff]   ;;  %p785_p13 = scmp.ne.s32.totalorder %s965_s14, 1 }
  0x38   : > { %806 = vmatprep.subr.bf16.mxu0 %v911_v17  ;;  %838 = vmatprep.subr.bf16.mxu1 %v911_v17  ;;  %v914_v20 = vld [vmem:[%s1090_s24 + $0x18] sm:$0xff]   ;;  %v919_v21 = vld [vmem:[%s1097_s12] sm:$0xff]   ;;  %v916_v24 = vld [vmem:[%s1090_s24 + $0x28] sm:$0xff]  }
  0x39   : > { %807 = vmatpush3.bf16.msra.mxu0 %v911_v17  ;;  %846 = vmatpush3.bf16.msra.mxu1 %v911_v17  ;;  %v920_v22 = vld [vmem:[%s1097_s12 + $0x20] sm:$0xff]   ;;  %v917_v25 = vld [vmem:[%s1090_s24 + $0x30] sm:$0xff]   ;;  %v918_v26 = vld [vmem:[%s1090_s24 + $0x38] sm:$0xff]  }
  0x3a   : > { %808 = vmatprep.subr.bf16.mxu0 %v912_v18  ;;  %839 = vmatprep.subr.bf16.mxu1 %v912_v18  ;;  %v915_v23 = vld [vmem:[%s1090_s24 + $0x20] sm:$0xff]   ;;  %v921_v27 = vld [vmem:[%s1097_s12 + $0x8] sm:$0xff]   ;;  %v923_v29 = vld [vmem:[%s1097_s12 + $0x10] sm:$0xff]  }
  0x3b   : > { %822 = vmatprep.mubr.bf16.mxu0 %v919_v21  ;;  %830 = vmatprep.mubr.bf16.mxu1 %v920_v22  ;;  %v922_v28 = vld [vmem:[%s1097_s12 + $0x28] sm:$0xff]   ;;  %v924_v30 = vld [vmem:[%s1097_s12 + $0x30] sm:$0xff]   ;;  %v925_v31 = vld [vmem:[%s1097_s12 + $0x18] sm:$0xff]  }
  0x3c   : > { %v926_v32 = vld [vmem:[%s1097_s12 + $0x38] sm:$0xff]   ;;  %v336_v33 = vld [vmem:[#allocation2 + $0x10] sm:$0xff]  ;;  %v334_v35 = vld [vmem:[#allocation2] sm:$0xff] }
  0x3d   : > { %809 = vmatpush3.bf16.msra.mxu0 %v912_v18  ;;  %847 = vmatpush3.bf16.msra.mxu1 %v912_v18  ;;  %v344_v34 = vld [vmem:[#allocation2 + $0x50] sm:$0xff]  ;;  %v342_v36 = vld [vmem:[#allocation2 + $0x40] sm:$0xff]  ;;  %v337_v39 = vld [vmem:[#allocation2 + $0x18] sm:$0xff] }
  0x3e   : > { %810 = vmatprep.subr.bf16.mxu0 %v913_v19  ;;  %840 = vmatprep.subr.bf16.mxu1 %v913_v19  ;;  %v345_v40 = vld [vmem:[#allocation2 + $0x58] sm:$0xff]  ;;  %v335_v45 = vld [vmem:[#allocation2 + $0x8] sm:$0xff]  ;;  %v340_v57 = vld [vmem:[#allocation2 + $0x30] sm:$0xff] }
  0x3f   : > { %v343_v46 = vld [vmem:[#allocation2 + $0x48] sm:$0xff]  ;;  %v348_v58 = vld [vmem:[#allocation2 + $0x70] sm:$0xff]  ;;  %v338_v59 = vld [vmem:[#allocation2 + $0x20] sm:$0xff] }
  0x40   : > { %v346_v60 = vld [vmem:[#allocation2 + $0x60] sm:$0xff]  ;;  %v341_v63 = vld [vmem:[#allocation2 + $0x38] sm:$0xff]  ;;  %v339_v5 = vld [vmem:[#allocation2 + $0x28] sm:$0xff] }
  0x41   : > { %811 = vmatpush3.bf16.msra.mxu0 %v913_v19  ;;  %848 = vmatpush3.bf16.msra.mxu1 %v913_v19  ;;  %v349_v0 = vld [vmem:[#allocation2 + $0x78] sm:$0xff]  ;;  %v347_v6 = vld [vmem:[#allocation2 + $0x68] sm:$0xff]  ;;  %v786_v18 = vld [vmem:[%s1159_s2] ss:$0 sm:$0xff] (!%p785_p13) }
  0x42   : > { %812 = vmatprep.subr.bf16.mxu0 %v914_v20  ;;  %841 = vmatprep.subr.bf16.mxu1 %v914_v20 }
  0x45   : > { %813 = vmatpush3.bf16.msra.mxu0 %v914_v20  ;;  %849 = vmatpush3.bf16.msra.mxu1 %v914_v20 }
  0x46   : > { %814 = vmatprep.subr.bf16.mxu0 %v915_v23  ;;  %842 = vmatprep.subr.bf16.mxu1 %v915_v23 }
  0x49   : > { %815 = vmatpush3.bf16.msra.mxu0 %v915_v23  ;;  %850 = vmatpush3.bf16.msra.mxu1 %v915_v23 }
  0x4a   : > { %816 = vmatprep.subr.bf16.mxu0 %v916_v24  ;;  %843 = vmatprep.subr.bf16.mxu1 %v916_v24 }
  0x4d   : > { %817 = vmatpush3.bf16.msra.mxu0 %v916_v24  ;;  %851 = vmatpush3.bf16.msra.mxu1 %v916_v24 }
  0x4e   : > { %818 = vmatprep.subr.bf16.mxu0 %v917_v25  ;;  %844 = vmatprep.subr.bf16.mxu1 %v917_v25 }
  0x51   : > { %819 = vmatpush3.bf16.msra.mxu0 %v917_v25  ;;  %852 = vmatpush3.bf16.msra.mxu1 %v917_v25 }
  0x52   : > { %820 = vmatprep.subr.bf16.mxu0 %v918_v26  ;;  %845 = vmatprep.subr.bf16.mxu1 %v918_v26 }
  0x55   : > { %821 = vmatpush3.bf16.msra.mxu0 %v918_v26  ;;  %853 = vmatpush3.bf16.msra.mxu1 %v918_v26 }
  0x58   : > { %823 = vmatmul.mubr.bf16.vlgmr.msra.gmra.mrb[0].mxu0 %v921_v27  ;;  %831 = vmatmul.mubr.bf16.vlgmr.msra.gmra.mrb[0].mxu1 %v922_v28 }
  0x59   : > { %826 = vmatprep.mubr.bf16.mxu0 %v923_v29  ;;  %834 = vmatprep.mubr.bf16.mxu1 %v924_v30 }
  0x60   : > { %827 = vmatmul.mubr.bf16.gmra.mrb[4].mxu0 %v925_v31  ;;  %835 = vmatmul.mubr.bf16.gmra.mrb[4].mxu1 %v926_v32 }
 0x12b   : > { %v824_v37 = vpop.f32.mrb[0].mxu0  ;;  %v832_v38 = vpop.f32.mrb[0].mxu1 }
 0x12c   : > { %v577_v41 = vadd.f32 %v824_v37, %v336_v33  ;;  %v585_v42 = vadd.f32 %v832_v38, %v344_v34  ;;  %v512_v43 = vpop.f32.mrb[1].mxu0  ;;  %v544_v44 = vpop.f32.mrb[1].mxu1 }
 0x12d   : > { %v575_v47 = vadd.f32 %v512_v43, %v334_v35  ;;  %v583_v48 = vadd.f32 %v544_v44, %v342_v36  ;;  %v825_v49 = vpop.f32.mrb[2].mxu0  ;;  %v833_v50 = vpop.f32.mrb[2].mxu1 }
 0x12e   : > { %593 = vst [vmem:[#allocation2 + $0x10] sm:$0xff] %v577_v41  ;;  %601 = vst [vmem:[#allocation2 + $0x50] sm:$0xff] %v585_v42  ;;  %v578_v51 = vadd.f32 %v825_v49, %v337_v39  ;;  %v586_v52 = vadd.f32 %v833_v50, %v345_v40  ;;  %v515_v53 = vpop.f32.mrb[3].mxu0  ;;  %v547_v54 = vpop.f32.mrb[3].mxu1 }
 0x12f   : > { %591 = vst [vmem:[#allocation2] sm:$0xff] %v575_v47  ;;  %599 = vst [vmem:[#allocation2 + $0x40] sm:$0xff] %v583_v48  ;;  %v576_v55 = vadd.f32 %v515_v53, %v335_v45  ;;  %v584_v56 = vadd.f32 %v547_v54, %v343_v46 }
 0x130   : > { %594 = vst [vmem:[#allocation2 + $0x18] sm:$0xff] %v578_v51  ;;  %602 = vst [vmem:[#allocation2 + $0x58] sm:$0xff] %v586_v52 }
 0x131   : > { %592 = vst [vmem:[#allocation2 + $0x8] sm:$0xff] %v576_v55  ;;  %600 = vst [vmem:[#allocation2 + $0x48] sm:$0xff] %v584_v56 }
 0x133   : > { %v828_v61 = vpop.f32.mrb[4].mxu0  ;;  %v836_v62 = vpop.f32.mrb[4].mxu1  ;;  %610 = sbr.rel (%p785_p13) target bundleno = 325 (0x145), region = 81 }
 0x134   : > { %v581_v1 = vadd.f32 %v828_v61, %v340_v57  ;;  %v589_v2 = vadd.f32 %v836_v62, %v348_v58  ;;  %v528_v3 = vpop.f32.mrb[5].mxu0  ;;  %v560_v4 = vpop.f32.mrb[5].mxu1 }
 0x135   : > { %v579_v7 = vadd.f32 %v528_v3, %v338_v59  ;;  %v587_v8 = vadd.f32 %v560_v4, %v346_v60  ;;  %v829_v9 = vpop.f32.mrb[6].mxu0  ;;  %v837_v10 = vpop.f32.mrb[6].mxu1  ;;  %v613_v22 = vld [vmem:[#allocation2 + $0x10] sm:$0xff] (!%p785_p13) }
 0x136   : > { %597 = vst [vmem:[#allocation2 + $0x30] sm:$0xff] %v581_v1  ;;  %605 = vst [vmem:[#allocation2 + $0x70] sm:$0xff] %v589_v2  ;;  %v582_v11 = vadd.f32 %v829_v9, %v341_v63  ;;  %v590_v12 = vadd.f32 %v837_v10, %v349_v0  ;;  %v531_v13 = vpop.f32.mrb[7].mxu0  ;;  %v563_v14 = vpop.f32.mrb[7].mxu1  ;;  %v611_v17 = vld [vmem:[#allocation2] sm:$0xff] (!%p785_p13)  ;;  %v636_v25 = vadd.f32 (!%p785_p13), %v786_v18, %v613_v22  ;;  %v621_v36 = vld [vmem:[#allocation2 + $0x50] sm:$0xff] (!%p785_p13) }
 0x137   : > { %595 = vst [vmem:[#allocation2 + $0x20] sm:$0xff] %v579_v7  ;;  %603 = vst [vmem:[#allocation2 + $0x60] sm:$0xff] %v587_v8  ;;  %v580_v15 = vadd.f32 %v531_v13, %v339_v5  ;;  %v588_v16 = vadd.f32 %v563_v14, %v347_v6  ;;  %v634_v20 = vadd.f32 (!%p785_p13), %v786_v18, %v611_v17  ;;  %v614_v23 = vld [vmem:[#allocation2 + $0x18] sm:$0xff] (!%p785_p13)  ;;  %v619_v34 = vld [vmem:[#allocation2 + $0x40] sm:$0xff] (!%p785_p13) }
 0x138   : > { %598 = vst [vmem:[#allocation2 + $0x38] sm:$0xff] %v582_v11  ;;  %606 = vst [vmem:[#allocation2 + $0x78] sm:$0xff] %v590_v12  ;;  %v612_v19 = vld [vmem:[#allocation2 + $0x8] sm:$0xff] (!%p785_p13)  ;;  %v637_v26 = vadd.f32 (!%p785_p13), %v786_v18, %v614_v23  ;;  %v642_v37 = vadd.f32 (!%p785_p13), %v786_v18, %v619_v34  ;;  %v644_v39 = vadd.f32 (!%p785_p13), %v786_v18, %v621_v36  ;;  %v622_v40 = vld [vmem:[#allocation2 + $0x58] sm:$0xff] (!%p785_p13) }
 0x139   : > { %596 = vst [vmem:[#allocation2 + $0x28] sm:$0xff] %v580_v15  ;;  %604 = vst [vmem:[#allocation2 + $0x68] sm:$0xff] %v588_v16  ;;  %v635_v21 = vadd.f32 (!%p785_p13), %v786_v18, %v612_v19  ;;  %v620_v35 = vld [vmem:[#allocation2 + $0x48] sm:$0xff] (!%p785_p13)  ;;  %v645_v43 = vadd.f32 (!%p785_p13), %v786_v18, %v622_v40 }
 0x13a   : > { %650 = vst [vmem:[%s1095_s29] sm:$0xff] %v634_v20  ;;  %652 = vst [vmem:[%s1095_s29 + $0x10] sm:$0xff] %v636_v25  ;;  %v643_v38 = vadd.f32 %v786_v18, %v620_v35 }
 0x13b   : > { %651 = vst [vmem:[%s1095_s29 + $0x8] sm:$0xff] %v635_v21  ;;  %653 = vst [vmem:[%s1095_s29 + $0x18] sm:$0xff] %v637_v26 }
 0x13c   : > { %658 = vst [vmem:[%s1095_s29 + $0x40] sm:$0xff] %v642_v37  ;;  %659 = vst [vmem:[%s1095_s29 + $0x48] sm:$0xff] %v643_v38 }
 0x13d   : > { %v617_v29 = vld [vmem:[#allocation2 + $0x30] sm:$0xff]  ;;  %660 = vst [vmem:[%s1095_s29 + $0x50] sm:$0xff] %v644_v39  ;;  %661 = vst [vmem:[%s1095_s29 + $0x58] sm:$0xff] %v645_v43 }
 0x13e   : > { %v615_v24 = vld [vmem:[#allocation2 + $0x20] sm:$0xff]  ;;  %v640_v32 = vadd.f32 %v786_v18, %v617_v29  ;;  %v625_v46 = vld [vmem:[#allocation2 + $0x70] sm:$0xff] }
 0x13f   : > { %v638_v27 = vadd.f32 %v786_v18, %v615_v24  ;;  %v618_v30 = vld [vmem:[#allocation2 + $0x38] sm:$0xff]  ;;  %v623_v41 = vld [vmem:[#allocation2 + $0x60] sm:$0xff]  ;;  %v648_v48 = vadd.f32 %v786_v18, %v625_v46 }
 0x140   : > { %v616_v28 = vld [vmem:[#allocation2 + $0x28] sm:$0xff]  ;;  %v641_v33 = vadd.f32 %v786_v18, %v618_v30  ;;  %656 = vst [vmem:[%s1095_s29 + $0x30] sm:$0xff] %v640_v32  ;;  %v646_v44 = vadd.f32 %v786_v18, %v623_v41  ;;  %v626_v47 = vld [vmem:[#allocation2 + $0x78] sm:$0xff] }
 0x141   : > { %v639_v31 = vadd.f32 %v786_v18, %v616_v28  ;;  %654 = vst [vmem:[%s1095_s29 + $0x20] sm:$0xff] %v638_v27  ;;  %v624_v42 = vld [vmem:[#allocation2 + $0x68] sm:$0xff]  ;;  %v649_v49 = vadd.f32 %v786_v18, %v626_v47  ;;  %664 = vst [vmem:[%s1095_s29 + $0x70] sm:$0xff] %v648_v48 }
 0x142   : > { %657 = vst [vmem:[%s1095_s29 + $0x38] sm:$0xff] %v641_v33  ;;  %v647_v45 = vadd.f32 %v786_v18, %v624_v42  ;;  %662 = vst [vmem:[%s1095_s29 + $0x60] sm:$0xff] %v646_v44 }
 0x143   : > { %655 = vst [vmem:[%s1095_s29 + $0x28] sm:$0xff] %v639_v31  ;;  %665 = vst [vmem:[%s1095_s29 + $0x78] sm:$0xff] %v649_v49 }
 0x144   : > { %663 = vst [vmem:[%s1095_s29 + $0x68] sm:$0xff] %v647_v45 }
 0x145 PF: > { %s13_s18 = sadd.s32 1, %s981_s18   ;;  %s1161_s12 = smov %s961_s13 }
 0x146   : > { %p10_p0 = scmp.ge.s32.totalorder %s13_s18, 6   ;;  %s1162_s13 = smov %s1055_s25 }
 0x147   : > { %s1163_s14 = smov %s973_s16  ;;  %s1164_s15 = smov %s977_s17 }
 0x148   : > { %s1165_s16 = smov %s1168_s19  ;;  %s1166_s17 = smov %s1172_s20 }
 0x149   :  { %12 = sbr.rel (!%p10_p0) target bundleno = 4 (0x4), region = 119 }

</bundles_post_ra>
